<compile_context>
chip_gen: v6e
topology: v6e:2x2x1
jax: 0.10.0
libtpu: 0.0.40
codegen_flags: <defaults>
</compile_context>

<pallas_src>
import jax
import jax.numpy as jnp
from jax.experimental import pallas as pl
from jax.experimental.pallas import tpu as pltpu


def _classifier_kernel(x_ref, w1_ref, b1_ref, w2_ref, b2_ref, out_ref, acc_ref):
    # x_ref:  (TB, C, T_HW)   tile of flattened NCHW input
    # w1_ref: (C, F_pad)      1x1 conv weight, pre-transposed, 1/(H*W) folded in
    # b1_ref: (1, F_pad)
    # w2_ref: (F_pad, CLS_pad)
    # b2_ref: (1, CLS_pad)
    # acc_ref:(TB, C, LG)     fp32 partial-sum accumulator (LG = min(128, T_HW))
    hw_idx = pl.program_id(1)

    @pl.when(hw_idx == 0)
    def _init():
        acc_ref[...] = jnp.zeros_like(acc_ref)

    # Partial global-average-pool: accumulate lane-groups elementwise (VPU adds);
    # the single cross-lane reduce (XLU) is deferred to the final step.
    x = x_ref[...].astype(jnp.float32)            # (TB, C, T_HW)
    lg = acc_ref.shape[-1]
    ng = x_ref.shape[-1] // lg                    # static, small (tile capped)
    part = acc_ref[...]
    for g in range(ng):
        part = part + x[:, :, g * lg:(g + 1) * lg]
    acc_ref[...] = part

    @pl.when(hw_idx == pl.num_programs(1) - 1)
    def _finish():
        # 1/(H*W) is folded into w1, so a plain sum gives the pooled feature.
        pooled = jnp.sum(acc_ref[...], axis=-1)   # (TB, C)

        # 1x1 Conv2d on the (B, C, 1, 1) pooled map == dense layer.
        h = jnp.dot(pooled, w1_ref[...],
                    preferred_element_type=jnp.float32) + b1_ref[...]

        # hswish: x * relu6(x + 3) / 6
        h = h * jnp.clip(h + 3.0, 0.0, 6.0) * (1.0 / 6.0)

        # Linear(filter, cls)
        out = jnp.dot(h, w2_ref[...],
                      preferred_element_type=jnp.float32) + b2_ref[...]
        out_ref[...] = out.astype(out_ref.dtype)


def _round_up(x, m):
    return ((x + m - 1) // m) * m


def classifier_forward(x_nchw, conv_w, conv_b, lin_w, lin_b,
                       *, batch_tile=None, hw_tile=None,
                       vmem_tile_budget_bytes=4 * 1024 * 1024):
    """x_nchw: (B, C, H, W); conv_w: (F, C, 1, 1); conv_b: (F,);
    lin_w: (CLS, F); lin_b: (CLS,).  Returns (B, CLS)."""
    B, C, H, W = x_nchw.shape
    F_ = conv_w.shape[0]
    CLS = lin_w.shape[0]
    HW = H * W

    # --- batch tile: full extent for tiny batches, 8-aligned otherwise ---------
    if batch_tile is None:
        TB = B if B <= 8 else min(128, _round_up(B, 8))
    else:
        TB = batch_tile
    B_pad = _round_up(B, TB)

    # --- spatial tile: lane-aligned (x128) unless HW itself is smaller ---------
    if hw_tile is None:
        if HW < 128:
            T_HW = HW
        else:
            cap = max(128, (vmem_tile_budget_bytes // (TB * C * 4)) // 128 * 128)
            T_HW = min(min(cap, 2048), _round_up(HW, 128))
    else:
        T_HW = hw_tile
    HW_pad = _round_up(HW, T_HW)

    # --- lane-dense (128-padded) feature / class dims ---------------------------
    F_pad = _round_up(F_, 128)
    CLS_pad = _round_up(CLS, 128)

    inv_hw = 1.0 / float(HW)   # true H*W, independent of any zero padding

    x_flat = x_nchw.reshape(B, C, HW)
    x_flat = jnp.pad(x_flat, ((0, B_pad - B), (0, 0), (0, HW_pad - HW)))

    w1 = (conv_w.reshape(F_, C).T.astype(jnp.float32)) * inv_hw       # (C, F)
    w1 = jnp.pad(w1, ((0, 0), (0, F_pad - F_)))
    b1 = jnp.pad(conv_b.reshape(1, F_).astype(jnp.float32),
                 ((0, 0), (0, F_pad - F_)))
    w2 = jnp.pad(lin_w.T.astype(jnp.float32),
                 ((0, F_pad - F_), (0, CLS_pad - CLS)))
    b2 = jnp.pad(lin_b.reshape(1, CLS).astype(jnp.float32),
                 ((0, 0), (0, CLS_pad - CLS)))

    LG = min(128, T_HW)
    grid = (B_pad // TB, HW_pad // T_HW)

    flops = (2 * B * C * HW                       # pooling adds
             + 2 * B_pad * C * F_pad              # 1x1 conv matmul
             + 2 * B_pad * F_pad * CLS_pad)       # classifier matmul
    bytes_accessed = (x_flat.size * x_flat.dtype.itemsize
                      + (w1.size + b1.size + w2.size + b2.size) * 4
                      + B_pad * CLS_pad * x_nchw.dtype.itemsize)

    out_padded = pl.pallas_call(
        _classifier_kernel,
        out_shape=jax.ShapeDtypeStruct((B_pad, CLS_pad), x_nchw.dtype),
        grid_spec=pltpu.PrefetchScalarGridSpec(
            num_scalar_prefetch=0,
            grid=grid,
            in_specs=[
                pl.BlockSpec((TB, C, T_HW), lambda b, h: (b, 0, h)),
                pl.BlockSpec((C, F_pad), lambda b, h: (0, 0)),
                pl.BlockSpec((1, F_pad), lambda b, h: (0, 0)),
                pl.BlockSpec((F_pad, CLS_pad), lambda b, h: (0, 0)),
                pl.BlockSpec((1, CLS_pad), lambda b, h: (0, 0)),
            ],
            out_specs=pl.BlockSpec((TB, CLS_pad), lambda b, h: (b, 0)),
            scratch_shapes=[pltpu.VMEM((TB, C, LG), jnp.float32)],
        ),
        compiler_params=pltpu.CompilerParams(
            dimension_semantics=("parallel", "arbitrary")),
        cost_estimate=pl.CostEstimate(
            flops=flops, transcendentals=0, bytes_accessed=bytes_accessed),
    )(x_flat, w1, b1, w2, b2)

    return out_padded[:B, :CLS]


def reference_forward(x_nchw, conv_w, conv_b, lin_w, lin_b):
    pooled = jnp.mean(x_nchw, axis=(2, 3))                                # (B, C)
    h = pooled @ conv_w.reshape(conv_w.shape[0], -1).T + conv_b           # (B, F)
    h = h * jnp.clip(h + 3.0, 0.0, 6.0) / 6.0
    return h @ lin_w.T + lin_b                                            # (B, CLS)


if __name__ == "__main__":
    key = jax.random.PRNGKey(0)
    k_x, k_w1, k_b1, k_w2, k_b2 = jax.random.split(key, 5)

    # Small shapes consistent with Classifier(in_channel=4, filter=8, cls=4)
    B, C, H, W = 2, 4, 16, 16
    FILTER, CLS = 8, 4

    x = jax.random.normal(k_x, (B, C, H, W), dtype=jnp.float32)
    conv_w = jax.random.normal(k_w1, (FILTER, C, 1, 1), dtype=jnp.float32) * 0.1
    conv_b = jax.random.normal(k_b1, (FILTER,), dtype=jnp.float32) * 0.1
    lin_w = jax.random.normal(k_w2, (CLS, FILTER), dtype=jnp.float32) * 0.1
    lin_b = jax.random.normal(k_b2, (CLS,), dtype=jnp.float32) * 0.1

    ref = reference_forward(x, conv_w, conv_b, lin_w, lin_b)

    # Multi-step spatial reduction path (grid = (1, 2)): exercises the
    # accumulator init / accumulate / finalize logic.
    out = classifier_forward(x, conv_w, conv_b, lin_w, lin_b, hw_tile=128)
    out = jax.block_until_ready(out)
    assert out.shape == (B, CLS), out.shape
    assert jnp.allclose(out, ref, atol=1e-4, rtol=1e-5), (out, ref)

    # Auto-tiling path (single spatial tile for these small shapes).
    out2 = classifier_forward(x, conv_w, conv_b, lin_w, lin_b)
    out2 = jax.block_until_ready(out2)
    assert jnp.allclose(out2, ref, atol=1e-4, rtol=1e-5), (out2, ref)

    print("KERNEL_OK")
</pallas_src>

<mosaic_0001>
module attributes {stable_mosaic.version = 11 : i64} {
  func.func @_classifier_kernel(%arg0: i32, %arg1: i32, %arg2: memref<2x4x128xf32, #tpu.memory_space<vmem>>, %arg3: memref<4x128xf32, #tpu.memory_space<vmem>>, %arg4: memref<1x128xf32, #tpu.memory_space<vmem>>, %arg5: memref<128x128xf32, #tpu.memory_space<vmem>>, %arg6: memref<1x128xf32, #tpu.memory_space<vmem>>, %arg7: memref<2x128xf32, #tpu.memory_space<vmem>>, %arg8: memref<2x4x128xf32, #tpu.memory_space<vmem>>) attributes {dimension_semantics = [#tpu.dimension_semantics<parallel>, #tpu.dimension_semantics<arbitrary>], iteration_bounds = array<i64: 1, 2>, scalar_prefetch = 0 : i64, scratch_operands = 1 : i64, tpu.core_type = #tpu.core_type<tc>, window_params = [{transform_indices = @transform_0, window_bounds = array<i64: 2, 4, 128>}, {pipeline_mode = #tpu.pipeline_mode<synchronous>, transform_indices = @transform_1, window_bounds = array<i64: 4, 128>}, {pipeline_mode = #tpu.pipeline_mode<synchronous>, transform_indices = @transform_2, window_bounds = array<i64: 1, 128>}, {pipeline_mode = #tpu.pipeline_mode<synchronous>, transform_indices = @transform_3, window_bounds = array<i64: 128, 128>}, {pipeline_mode = #tpu.pipeline_mode<synchronous>, transform_indices = @transform_4, window_bounds = array<i64: 1, 128>}, {transform_indices = @transform_5, window_bounds = array<i64: 2, 128>}]} {
    %c0_i32 = arith.constant 0 : i32
    %0 = arith.cmpi eq, %arg1, %c0_i32 : i32
    %1 = arith.extui %0 : i1 to i32
    %c0_i32_0 = arith.constant 0 : i32
    %2 = arith.cmpi ne, %1, %c0_i32_0 : i32
    scf.if %2 {
      %cst = arith.constant 0.000000e+00 : f32
      %10 = vector.broadcast %cst : f32 to vector<2x4x128xf32>
      %c0_10 = arith.constant 0 : index
      %c0_11 = arith.constant 0 : index
      %c0_12 = arith.constant 0 : index
      %11 = vector.load %arg8[%c0_10, %c0_11, %c0_12] : memref<2x4x128xf32, #tpu.memory_space<vmem>>, vector<2x4x128xf32>
      tpu.vector_store %arg8[%c0_10, %c0_11, %c0_12], %10 {strides = array<i32>} : memref<2x4x128xf32, #tpu.memory_space<vmem>>, vector<2x4x128xf32>,
    } else {
    }
    %c0 = arith.constant 0 : index
    %c0_1 = arith.constant 0 : index
    %c0_2 = arith.constant 0 : index
    %3 = vector.load %arg2[%c0, %c0_1, %c0_2] : memref<2x4x128xf32, #tpu.memory_space<vmem>>, vector<2x4x128xf32>
    %c0_3 = arith.constant 0 : index
    %c0_4 = arith.constant 0 : index
    %c0_5 = arith.constant 0 : index
    %4 = vector.load %arg8[%c0_3, %c0_4, %c0_5] : memref<2x4x128xf32, #tpu.memory_space<vmem>>, vector<2x4x128xf32>
    %5 = arith.addf %4, %3 : vector<2x4x128xf32>
    %c0_6 = arith.constant 0 : index
    %c0_7 = arith.constant 0 : index
    %c0_8 = arith.constant 0 : index
    %6 = vector.load %arg8[%c0_6, %c0_7, %c0_8] : memref<2x4x128xf32, #tpu.memory_space<vmem>>, vector<2x4x128xf32>
    tpu.vector_store %arg8[%c0_6, %c0_7, %c0_8], %5 {strides = array<i32>} : memref<2x4x128xf32, #tpu.memory_space<vmem>>, vector<2x4x128xf32>,
    %c1_i32 = arith.constant 1 : i32
    %7 = arith.cmpi eq, %arg1, %c1_i32 : i32
    %8 = arith.extui %7 : i1 to i32
    %c0_i32_9 = arith.constant 0 : i32
    %9 = arith.cmpi ne, %8, %c0_i32_9 : i32
    scf.if %9 {
      %c0_10 = arith.constant 0 : index
      %c0_11 = arith.constant 0 : index
      %c0_12 = arith.constant 0 : index
      %10 = vector.load %arg8[%c0_10, %c0_11, %c0_12] : memref<2x4x128xf32, #tpu.memory_space<vmem>>, vector<2x4x128xf32>
      %cst = arith.constant dense<0.000000e+00> : vector<2x4xf32>
      %11 = vector.multi_reduction <add>, %10, %cst [2] : vector<2x4x128xf32> to vector<2x4xf32>
      %c0_13 = arith.constant 0 : index
      %c0_14 = arith.constant 0 : index
      %12 = vector.load %arg3[%c0_13, %c0_14] : memref<4x128xf32, #tpu.memory_space<vmem>>, vector<4x128xf32>
      %cst_15 = arith.constant dense<0.000000e+00> : vector<2x128xf32>
      %13 = tpu.matmul %11, %12, %cst_15 {dimension_numbers = #tpu.dot_dimension_numbers<[1], [0], [0], [1], [0, 0, 1, 1], [], []>} : vector<2x4xf32>, vector<4x128xf32>, vector<2x128xf32> -> vector<2x128xf32>
      %c0_16 = arith.constant 0 : index
      %c0_17 = arith.constant 0 : index
      %14 = vector.load %arg4[%c0_16, %c0_17] : memref<1x128xf32, #tpu.memory_space<vmem>>, vector<1x128xf32>
      %15 = vector.broadcast %14 : vector<1x128xf32> to vector<2x128xf32>
      %16 = arith.addf %13, %15 : vector<2x128xf32>
      %cst_18 = arith.constant 3.000000e+00 : f32
      %17 = vector.broadcast %cst_18 : f32 to vector<2x128xf32>
      %18 = arith.addf %16, %17 : vector<2x128xf32>
      %cst_19 = arith.constant 0.000000e+00 : f32
      %cst_20 = arith.constant 6.000000e+00 : f32
      %19 = vector.broadcast %cst_19 : f32 to vector<2x128xf32>
      %20 = arith.maximumf %19, %18 : vector<2x128xf32>
      %21 = vector.broadcast %cst_20 : f32 to vector<2x128xf32>
      %22 = arith.minimumf %21, %20 : vector<2x128xf32>
      %23 = arith.mulf %16, %22 : vector<2x128xf32>
      %cst_21 = arith.constant 0.166666672 : f32
      %24 = vector.broadcast %cst_21 : f32 to vector<2x128xf32>
      %25 = arith.mulf %23, %24 : vector<2x128xf32>
      %c0_22 = arith.constant 0 : index
      %c0_23 = arith.constant 0 : index
      %26 = vector.load %arg5[%c0_22, %c0_23] : memref<128x128xf32, #tpu.memory_space<vmem>>, vector<128x128xf32>
      %cst_24 = arith.constant dense<0.000000e+00> : vector<2x128xf32>
      %27 = tpu.matmul %25, %26, %cst_24 {dimension_numbers = #tpu.dot_dimension_numbers<[1], [0], [0], [1], [0, 0, 1, 1], [], []>} : vector<2x128xf32>, vector<128x128xf32>, vector<2x128xf32> -> vector<2x128xf32>
      %c0_25 = arith.constant 0 : index
      %c0_26 = arith.constant 0 : index
      %28 = vector.load %arg6[%c0_25, %c0_26] : memref<1x128xf32, #tpu.memory_space<vmem>>, vector<1x128xf32>
      %29 = vector.broadcast %28 : vector<1x128xf32> to vector<2x128xf32>
      %30 = arith.addf %27, %29 : vector<2x128xf32>
      %c0_27 = arith.constant 0 : index
      %c0_28 = arith.constant 0 : index
      %31 = vector.load %arg7[%c0_27, %c0_28] : memref<2x128xf32, #tpu.memory_space<vmem>>, vector<2x128xf32>
      tpu.vector_store %arg7[%c0_27, %c0_28], %30 {strides = array<i32>} : memref<2x128xf32, #tpu.memory_space<vmem>>, vector<2x128xf32>,
    } else {
    }
    return
  }
  func.func @transform_0(%arg0: i32, %arg1: i32) -> (i32, i32, i32) {
    %c0_i32 = arith.constant 0 : i32
    %c0_i32_0 = arith.constant 0 : i32
    return %arg0, %c0_i32, %arg1 : i32, i32, i32
  }
  func.func @transform_1(%arg0: i32, %arg1: i32) -> (i32, i32) {
    %c0_i32 = arith.constant 0 : i32
    %c0_i32_0 = arith.constant 0 : i32
    %c0_i32_1 = arith.constant 0 : i32
    return %c0_i32, %c0_i32_0 : i32, i32
  }
  func.func @transform_2(%arg0: i32, %arg1: i32) -> (i32, i32) {
    %c0_i32 = arith.constant 0 : i32
    %c0_i32_0 = arith.constant 0 : i32
    %c0_i32_1 = arith.constant 0 : i32
    return %c0_i32, %c0_i32_0 : i32, i32
  }
  func.func @transform_3(%arg0: i32, %arg1: i32) -> (i32, i32) {
    %c0_i32 = arith.constant 0 : i32
    %c0_i32_0 = arith.constant 0 : i32
    %c0_i32_1 = arith.constant 0 : i32
    return %c0_i32, %c0_i32_0 : i32, i32
  }
  func.func @transform_4(%arg0: i32, %arg1: i32) -> (i32, i32) {
    %c0_i32 = arith.constant 0 : i32
    %c0_i32_0 = arith.constant 0 : i32
    %c0_i32_1 = arith.constant 0 : i32
    return %c0_i32, %c0_i32_0 : i32, i32
  }
  func.func @transform_5(%arg0: i32, %arg1: i32) -> (i32, i32) {
    %c0_i32 = arith.constant 0 : i32
    %c0_i32_0 = arith.constant 0 : i32
    return %arg0, %c0_i32 : i32, i32
  }
}

</mosaic_0001>

<bundles_post_ra>
// kernel: tpu_custom_call.1
= control target key start
LH: loop header
LB: loop body
LE: loop exit
PB: predicated region body
PF: predicated region fallthrough
CT: control target
= control target key end

     0   :  { %10 = vsyncpa [#allocation4], 0  ;;  %s1129_s0 = inlined_call_operand.hbm [shape: f32[2,4,256], index: 0, kind: input, shape index: {}]   ;;  %s1130_s1 = inlined_call_operand.hbm [shape: f32[4,128], index: 1, kind: input, shape index: {}]   ;;  %s1131_s2 = inlined_call_operand.vmem [shape: f32[1,128], index: 2, kind: input, shape index: {}]   ;;  %s1132_s3 = inlined_call_operand.hbm [shape: f32[128,128], index: 3, kind: input, shape index: {}]   ;;  %s1133_s4 = inlined_call_operand.vmem [shape: f32[1,128], index: 4, kind: input, shape index: {}]   ;;  %s1134_s5 = inlined_call_operand.hbm [shape: f32[2,128], index: 5, kind: output, shape index: {}]  }
   0x1   :  { %12 = vsyncpa [#allocation4 + $0x1], 0 }
   0x2   :  { %13 = vsyncpa [#allocation7], 0 }
   0x3   :  { %14 = vsyncpa [#allocation5], 0  ;;  %s970_s18 = smov 0   ;;  %s972_s19 = smov 0  }
   0x4   :  { %s974_s20 = smov 0   ;;  %s976_s21 = smov 0  }
   0x5   :  { %s978_s22 = smov 0   ;;  %s980_s23 = smov 0  }
   0x6 LB: > { %s1139_s24 = sadd.s32 4294967295, %s927_s23   ;;  %s41_s25 = sadd.s32 1, %s915_s20  ;;  %s927_s23 = sphi %s980_s23, %s20_s23   ;;  %s923_s22 = sphi %s978_s22, %s1156_s22   ;;  %s919_s21 = sphi %s976_s21, %s1155_s21   ;;  %s915_s20 = sphi %s974_s20, %s1154_s20   ;;  %s911_s19 = sphi %s972_s19, %s1153_s19   ;;  %s907_s18 = sphi %s970_s18, %s1152_s18  }
   0x7   : > { %p48_p0 = scmp.ne.s32.totalorder %s915_s20, %s911_s19  ;;  %p49_p1 = scmp.eq.s32.totalorder %s927_s23, 0 }
   0x8   : > { %p54_p2 = scmp.ne.s32.totalorder %s911_s19, %s907_s18  ;;  %p1006_p3 = scmp.eq.s32.totalorder %s1139_s24, 0 }
   0x9   : > { %p50_p4 = por %p49_p1, %p48_p0  ;;  %p596_p5 = scmp.ge.s32.totalorder %s927_s23, 1 }
   0xa   : > { %s1141_s26 = scalar_select %p1006_p3, 1, 0 }
   0xb   : > { %p1013_p6 = por %p1006_p3, %p54_p2  ;;  %p175_p7 = scmp.lt.s32.totalorder %s927_s23, 3 }
   0xc   : > { %s929_s29 = smov [#allocation6]   ;;  %p702_p10 = scmp.lt.s32.totalorder %s927_s23, 2 }
   0xd   : > { %s1142_s27 = scalar_select %p1013_p6, 1, 0 }
   0xe   : > { %p1018_p8 = pnand %p596_p5, %p175_p7  ;;  %s188_s30 = sshll.u32 %s929_s29, 4  ;;  %s189_s30 = int_to_ptr.vmem [resolvable:$true] %s188_s30 }
   0xf   : > { %p1031_p12 = pnand %p702_p10, %p50_p4  ;;  %s930_s8 = smov [#allocation8]  }
  0x10   : > { %s1143_s28 = scalar_select %p1018_p8, 1, 0 }
  0x11   : > { %p689_p9 = pneg %p1018_p8  ;;  %s201_s9 = sshll.u32 %s930_s8, 4  ;;  %s202_s9 = int_to_ptr.vmem [resolvable:$true] %s201_s9 }
  0x12   : > { %s776_s10 = scalar_lea.vmem %s189_s30, 64  ;;  %p784_p5 = scmp.lt.s32.totalorder %s189_s30, %s189_s30 }
  0x13   : > { %p1027_p11 = pnand %p689_p9, %p1006_p3  ;;  %p777_p0 = scmp.ne.s32.totalorder %s189_s30, %s776_s10 }
  0x14   : > { %p785_p7 = scmp.lt.s32.totalorder %s776_s10, %s776_s10 }
  0x15   : > { %p767_p13 = pneg %p1027_p11 }
  0x16   : > { %p786_p9 = por %p785_p7, %p784_p5 }
  0x17   : > { %p779_p1 = pnand %p777_p0, %p767_p13 }
  0x19   : > { %p780_p2 = pneg %p779_p1 }
  0x1b   : > { %p787_p3 = pnand %p786_p9, %p780_p2 }
  0x1d   : > { %790 = shalt.err (!%p787_p3)
}
  0x1e   : > { %692 = dma.hbm_to_vmem [thread:$0]  (!%p1027_p11), %s1130_s1, 64, %s189_s30, [#allocation7]  }
  0x1f   : > { %s802_s13 = scalar_lea.vmem %s202_s9, 2048  ;;  %p810_p1 = scmp.lt.s32.totalorder %s202_s9, %s202_s9 }
  0x20   : > { %p803_p4 = scmp.ne.s32.totalorder %s202_s9, %s802_s13  ;;  %p811_p6 = scmp.lt.s32.totalorder %s802_s13, %s802_s13 }
  0x22   : > { %p805_p10 = pnand %p803_p4, %p767_p13  ;;  %p812_p8 = por %p811_p6, %p810_p1 }
  0x24   : > { %p806_p0 = pneg %p805_p10 }
  0x26   : > { %p813_p5 = pnand %p812_p8, %p806_p0 }
  0x28   : > { %816 = shalt.err (!%p813_p5)
}
  0x29   : > { %s1140_s14 = smov 128   ;;  %s932_s15 = smov 8  }
  0x2a   : > { %695 = dma.hbm_to_vmem [thread:$0]  (!%p1027_p11), %s1132_s3, 2048, %s202_s9, [#allocation7], %s1140_s14, %s1140_s14, %s932_s15  }
  0x2b   : > { %s218_s18 = sand.u32 1, %s915_s20   ;;  %s29_s29 = sadd.s32 1, %s923_s22 }
  0x2c   : > { %p30_p3 = scmp.ge.s32.totalorder %s29_s29, 2  ;;  %s600_s30 = sshll.u32 %s218_s18, 3 }
  0x2d   : > { %s601_s8 = sshll.u32 %s923_s22, 6  ;;  %s222_s6 = scalar_lea.vmem [#allocation3], %s600_s30 }
  0x2e   : > { %s1158_s29 = smov (%p30_p3, %s29_s29), 0  ;;  %s230_s12 = scalar_lea.hbm %s1129_s0, %s601_s8 }
  0x2f   : > { %s231_s13 = sshll.u32 %s222_s6, 4  ;;  %s37_s24 = ssub.s32 %s923_s22, %s1158_s29  ;;  %s232_s13 = int_to_ptr.vmem [resolvable:$true] %s231_s13 }
  0x30   : > { %p39_p6 = scmp.eq.s32.totalorder %s37_s24, 0  ;;  %s219_s9 = scalar_lea.sflag [#allocation4], %s218_s18 }
  0x31   : > { %p819_p8 = pneg %p1031_p12  ;;  %s830_s15 = scalar_lea.vmem %s232_s13, 128 }
  0x32   : > { %s1068_s16 = scalar_select %p39_p6, %s915_s20, %s41_s25  }
  0x33   : > { %p831_p11 = scmp.ne.s32.totalorder %s232_s13, %s830_s15  ;;  %s933_s17 = smov [#allocation3]  }
  0x34   : > { %s835_s14 = sshll.u32 %s933_s17, 4  ;;  %s836_s14 = int_to_ptr.vmem [resolvable:$false] %s835_s14 }
  0x35   : > { %p833_p13 = pnand %p831_p11, %p819_p8  ;;  %s837_s10 = scalar_lea.vmem %s836_s14, 256 }
  0x36   : > { %p838_p7 = scmp.lt.s32.totalorder %s232_s13, %s836_s14  ;;  %p839_p9 = scmp.lt.s32.totalorder %s837_s10, %s830_s15 }
  0x37   : > { %p834_p2 = pneg %p833_p13 }
  0x38   : > { %p840_p4 = por %p839_p9, %p838_p7 }
  0x3a   : > { %p841_p10 = pnand %p840_p4, %p834_p2 }
  0x3c   : > { %844 = shalt.err (!%p841_p10)
}
  0x3d   : > { %s934_s24 = smov 64   ;;  %s935_s25 = smov 4  }
  0x3e   : > { %s1146_s18 = smov 128   ;;  %p1147_p0 = scmp.ne.s32.totalorder %s1143_s28, 0 }
  0x3f   : > { %699 = dma.hbm_to_vmem [thread:$0]  (!%p1031_p12), %s230_s12, 128, %s232_s13, %s219_s9, %s1146_s18, %s934_s24, %s935_s25  }
  0x40   : > { %243 = sbr.rel (%p1147_p0) target bundleno = 661 (0x295), region = 40  ;;  %s245_s30 = sand.u32 (!%p1147_p0), 1, %s911_s19  }
  0x41   : > { %s603_s8 = sshll.u32 (!%p1147_p0), %s245_s30, 3  ;;  %s246_s11 = scalar_lea.sflag (!%p1147_p0), [#allocation4], %s245_s30 }
  0x42   : > { %s249_s6 = scalar_lea.vmem (!%p1147_p0), [#allocation3], %s603_s8  ;;  %p1148_p1 = scmp.ne.s32.totalorder (!%p1147_p0), %s1142_s27, 0 }
  0x45   : > { %894 = dma.done.wait (%p1148_p1), %s246_s11, 128  }
  0x46   : > { %896 = vsyncadd (%p1148_p1), %s246_s11, 4294967168  ;;  %p1149_p5 = scmp.ne.s32.totalorder %s1141_s26, 0 }
  0x48   : > { %898 = dma.done.wait (%p1149_p5), [#allocation7], 2112  }
  0x49   : > { %900 = vsyncadd (%p1149_p5), [#allocation7], 4294965184  ;;  %p606_p12 = scmp.ne.s32.totalorder %s919_s21, 0 }
  0x4b   : > { %283 = sbr.rel (%p606_p12) target bundleno = 82 (0x52), region = 56 }
  0x50   : > { %v936_v0 = vmov 0.0  }
  0x51   : > { %284 = vst [vmem:[#allocation2] sm:$0xf] %v936_v0  ;;  %285 = vst [vmem:[#allocation2 + $0x4] sm:$0xf] %v936_v0 }
  0x52 PF: > { %v286_v1 = vld [vmem:[%s249_s6] sm:$0xf]  ;;  %v287_v3 = vld [vmem:[%s249_s6 + $0x4] sm:$0xf]  ;;  %p607_p3 = scmp.ne.s32.totalorder %s919_s21, 1 }
  0x57   : > { %297 = sbr.rel (%p607_p3) target bundleno = 646 (0x286), region = 60 }
  0x58   : > { %v288_v2 = vld [vmem:[#allocation2] sm:$0xf]  ;;  %v289_v5 = vld [vmem:[#allocation2 + $0x4] sm:$0xf] }
  0x59   : > { %v290_v4 = vadd.f32 %v288_v2, %v286_v1  ;;  %v291_v6 = vadd.f32 %v289_v5, %v287_v3 }
  0x5b   : > { %292 = vst [vmem:[#allocation2] sm:$0xf] %v290_v4  ;;  %293 = vst [vmem:[#allocation2 + $0x4] sm:$0xf] %v291_v6 }
  0x5c   : > { %vm300_vm0 = vcmask 1043456   ;;  %v307_v11 = vld [vmem:[#allocation6] sm:$0xf]  ;;  %v937_v12 = vmov 0.0   ;;  %vm938_vm1 = vmmov 0   ;;  %v424_v14 = vld [vmem:[#allocation8 + $0x70] sm:$0xff]  ;;  %v317_v22 = vlaneseq }
  0x5d   : > { %635 = vmatprep.subr.mxu0 %v937_v12  ;;  %637 = vmatprep.mubr.msk.f32.mxu0 %vm938_vm1, %v937_v12  ;;  %v425_v13 = vld [vmem:[#allocation8 + $0x78] sm:$0xff]  ;;  %v423_v15 = vld [vmem:[#allocation8 + $0x68] sm:$0xff]  ;;  %v422_v16 = vld [vmem:[#allocation8 + $0x60] sm:$0xff]  ;;  %vm327_vm2 = vcmask 1041409   ;;  %vm329_vm3 = vcmask 31744  }
  0x5e   : > { %636 = vmatpush3.msk.msra.mxu0 %vm300_vm0, %v307_v11  ;;  %640 = vmatprep.subr.mxu1 %v937_v12  ;;  %v421_v17 = vld [vmem:[#allocation8 + $0x58] sm:$0xff]  ;;  %v420_v18 = vld [vmem:[#allocation8 + $0x50] sm:$0xff]  ;;  %v419_v19 = vld [vmem:[#allocation8 + $0x48] sm:$0xff]  ;;  %v318_v23 = vand.u32 127, %v317_v22  ;;  %v320_v24 = vshrl.u32 %v317_v22, 7 }
  0x5f   : > { %672 = vmatprep.mubr.msk.f32.mxu1 %vm938_vm1, %v937_v12  ;;  %641 = vmatpush3.msra.mxu1 %v425_v13  ;;  %v418_v20 = vld [vmem:[#allocation8 + $0x40] sm:$0xff]  ;;  %v417_v21 = vld [vmem:[#allocation8 + $0x38] sm:$0xff]  ;;  %v416_v31 = vld [vmem:[#allocation8 + $0x30] sm:$0xff] }
  0x60   : > { %642 = vmatprep.subr.mxu1 %v937_v12  ;;  %v321_v26 = vsub.s32 %v318_v23, %v320_v24  ;;  %v415_v32 = vld [vmem:[#allocation8 + $0x28] sm:$0xff]  ;;  %v414_v33 = vld [vmem:[#allocation8 + $0x20] sm:$0xff]  ;;  %v413_v34 = vld [vmem:[#allocation8 + $0x18] sm:$0xff] }
  0x61   : > { %643 = vmatpush3.msra.mxu1 %v424_v14  ;;  %v412_v35 = vld [vmem:[#allocation8 + $0x10] sm:$0xff]  ;;  %v411_v36 = vld [vmem:[#allocation8 + $0x8] sm:$0xff]  ;;  %v410_v37 = vld [vmem:[#allocation8] sm:$0xff] }
  0x62   : > { %v298_v7 = vld [vmem:[#allocation2] sm:$0xf]  ;;  %v299_v8 = vld [vmem:[#allocation2 + $0x4] sm:$0xf]  ;;  %644 = vmatprep.subr.mxu1 %v937_v12 }
  0x63   : > { %v301_v9 = vsel %vm300_vm0, %v298_v7, 0.0  ;;  %v304_v10 = vsel %vm300_vm0, %v299_v8, 0.0  ;;  %645 = vmatpush3.msra.mxu1 %v423_v15  ;;  %v608_v38 = vld [vmem:[%s1131_s2] ss:$0 sm:$0xff] }
  0x64   : > { %302 = vadd.xlane.f32.xlu0 %v301_v9  ;;  %646 = vmatprep.subr.mxu1 %v937_v12  ;;  %v611_v47 = vld [vmem:[%s1133_s4] ss:$0 sm:$0xff] }
  0x65   : > { %647 = vmatpush3.msra.mxu1 %v422_v16 }
  0x66   : > { %648 = vmatprep.subr.mxu1 %v937_v12 }
  0x67   : > { %649 = vmatpush3.msra.mxu1 %v421_v17 }
  0x68   : > { %305 = vadd.xlane.f32.xlu0 %v304_v10  ;;  %650 = vmatprep.subr.mxu1 %v937_v12 }
  0x69   : > { %651 = vmatpush3.msra.mxu1 %v420_v18 }
  0x6a   : > { %652 = vmatprep.subr.mxu1 %v937_v12 }
  0x6b   : > { %653 = vmatpush3.msra.mxu1 %v419_v19 }
  0x6c   : > { %654 = vmatprep.subr.mxu1 %v937_v12 }
  0x6d   : > { %655 = vmatpush3.msra.mxu1 %v418_v20 }
  0x6e   : > { %656 = vmatprep.subr.mxu1 %v937_v12 }
  0x6f   : > { %657 = vmatpush3.msra.mxu1 %v417_v21 }
  0x70   : > { %658 = vmatprep.subr.mxu1 %v937_v12 }
  0x71   : > { %659 = vmatpush3.msra.mxu1 %v416_v31 }
  0x72   : > { %660 = vmatprep.subr.mxu1 %v937_v12 }
  0x73   : > { %661 = vmatpush3.msra.mxu1 %v415_v32 }
  0x74   : > { %662 = vmatprep.subr.mxu1 %v937_v12 }
  0x75   : > { %663 = vmatpush3.msra.mxu1 %v414_v33 }
  0x76   : > { %664 = vmatprep.subr.mxu1 %v937_v12 }
  0x77   : > { %665 = vmatpush3.msra.mxu1 %v413_v34 }
  0x78   : > { %666 = vmatprep.subr.mxu1 %v937_v12 }
  0x79   : > { %667 = vmatpush3.msra.mxu1 %v412_v35 }
  0x7a   : > { %668 = vmatprep.subr.mxu1 %v937_v12 }
  0x7b   : > { %669 = vmatpush3.msra.mxu1 %v411_v36 }
  0x7c   : > { %670 = vmatprep.subr.mxu1 %v937_v12 }
  0x7d   : > { %671 = vmatpush3.msra.mxu1 %v410_v37 }
  0xed   : > { %v303_v25 = vpop.xlane.xlu0 %302 }
  0xee   : > { %v322_v28 = vrot.slane %v303_v25, %v321_v26 }
  0xf1   : > { %v306_v27 = vpop.xlane.xlu0 %305 }
  0xf2   : > { %v326_v29 = vrot.slane %v306_v27, %v321_v26 }
  0xf4   : > { %v328_v30 = vsel %vm327_vm2, %v326_v29, %v322_v28 }
  0xf5   : > { %638 = vmatmul.mubr.msk.f32.vlgmr.msra.gmra.mxu0 %vm329_vm3, %v328_v30 }
 0x1b5   : > { %v401_v39 = vpop.f32.mrf.mxu0 }
 0x1b6   : > { %v402_v40 = vadd.f32 %v608_v38, %v401_v39 }
 0x1b7   : > { %v639_v41 = vpop.f32.mrf.mxu0 }
 0x1b8   : > { %v405_v42 = vadd.f32 3.0, %v402_v40 }
 0x1ba   : > { %v406_v43 = vmax.f32 %v405_v42, 0.0 }
 0x1bc   : > { %v407_v44 = vmin.f32 %v406_v43, 6.0 }
 0x1be   : > { %v408_v45 = vmul.f32 %v407_v44, %v402_v40 }
 0x1c0   : > { %v409_v46 = vmul.f32 0.16666667, %v408_v45 }
 0x1c2   : > { %673 = vmatmul.mubr.f32.vlgmr.msra.gmra.mxu1 %v409_v46 }
 0x282   : > { %v499_v48 = vpop.f32.mrf.mxu1 }
 0x283   : > { %v500_v49 = vadd.f32 %v611_v47, %v499_v48 }
 0x284   : > { %v674_v50 = vpop.f32.mrf.mxu1 }
 0x285   : > { %503 = vst [vmem:[#allocation9] sm:$0x3] %v500_v49 }
 0x286 PF: > { %s1150_s7 = sadd.s32 4294967295, %s927_s23   ;;  %s939_s12 = smov [#allocation9]  }
 0x287   : > { %p1096_p6 = scmp.eq.s32.totalorder %s1150_s7, 1  ;;  %s513_s13 = sshll.u32 %s939_s12, 4  ;;  %s514_s13 = int_to_ptr.vmem [resolvable:$true] %s513_s13 }
 0x288   : > { %s845_s9 = scalar_lea.vmem %s514_s13, 32  ;;  %p852_p2 = scmp.lt.s32.totalorder %s514_s13, %s514_s13 }
 0x289   : > { %p846_p8 = scmp.ne.s32.totalorder %s514_s13, %s845_s9  ;;  %p853_p7 = scmp.lt.s32.totalorder %s845_s9, %s845_s9 }
 0x28b   : > { %p847_p11 = pnand %p846_p8, %p1096_p6  ;;  %p854_p9 = por %p853_p7, %p852_p2 }
 0x28d   : > { %p848_p13 = pneg %p847_p11 }
 0x28f   : > { %p855_p4 = pnand %p854_p9, %p848_p13 }
 0x291   : > { %858 = shalt.err (!%p855_p4)
}
 0x292   : > { %686 = dma.vmem_to_hbm [thread:$0]  (%p1096_p6), %s514_s13, 32, %s1134_s5, [#allocation5]  }
 0x293   : > { %902 = dma.done.wait (%p1096_p6), [#allocation5], 32  }
 0x294   : > { %904 = vsyncadd (%p1096_p6), [#allocation5], 4294967264 }
 0x295 PF: > { %s20_s23 = sadd.s32 1, %s927_s23   ;;  %s1152_s18 = smov %s911_s19 }
 0x296   : > { %p17_p10 = scmp.ge.s32.totalorder %s20_s23, 4   ;;  %s1153_s19 = smov %s915_s20 }
 0x297   : > { %s1154_s20 = smov %s1068_s16  ;;  %s1155_s21 = smov %s923_s22 }
 0x298   : > { %s1156_s22 = smov %s1158_s29  ;;  %19 = sbr.rel (!%p17_p10) target bundleno = 6 (0x6), region = 94 }
 0x29d   :  { %526 = vsyncpa [#allocation4], 1 }
 0x29e   :  { %528 = vsyncpa [#allocation4 + $0x1], 1 }
 0x29f   :  { %529 = vsyncpa [#allocation7], 1 }
 0x2a0   :  { %530 = vsyncpa [#allocation5], 1 }
 0x2a1   :  { %532 = vsyncpa [#allocation5 + $0x1], 1 }

</bundles_post_ra>
